<compile_context>
chip_gen: v5e
topology: v5e:2x2
jax: 0.10.0
libtpu: 0.0.40
codegen_flags: <defaults>
</compile_context>

<pallas_src>
import numpy as np
import jax
import jax.numpy as jnp
from jax.experimental import pallas as pl
from jax.experimental.pallas import tpu as pltpu


# ---------------------------------------------------------------------------
# Small helpers
# ---------------------------------------------------------------------------
def _round_up(x, m):
    return ((x + m - 1) // m) * m


def _vmem_limit_bytes():
    try:
        cap = int(pltpu.get_tpu_info().vmem_capacity_bytes)
    except Exception:
        cap = 64 * 1024 * 1024
    return int(0.75 * cap)


# ---------------------------------------------------------------------------
# Host-side linear-operator construction (numpy, cached per (H, W))
# ---------------------------------------------------------------------------
def _adaptive_pool_matrix(n_in, n_out):
    """(n_out, n_in) averaging matrix replicating nn.AdaptiveAvgPool2d bins."""
    p = np.zeros((n_out, n_in), np.float32)
    for i in range(n_out):
        s = (i * n_in) // n_out
        e = -((-(i + 1) * n_in) // n_out)  # ceil((i+1)*n_in / n_out)
        p[i, s:e] = 1.0 / (e - s)
    return p


def _bilinear_matrix(n_out, n_in, align_corners):
    """(n_out, n_in) matrix replicating F.interpolate(mode='bilinear') on one axis."""
    u = np.zeros((n_out, n_in), np.float32)
    for i in range(n_out):
        if n_in == 1:
            u[i, 0] = 1.0
            continue
        if align_corners:
            src = i * (n_in - 1) / (n_out - 1) if n_out > 1 else 0.0
        else:
            src = (i + 0.5) * n_in / n_out - 0.5
            src = max(src, 0.0)
        i0 = min(int(np.floor(src)), n_in - 1)
        i1 = min(i0 + 1, n_in - 1)
        w1 = src - i0
        u[i, i0] += 1.0 - w1
        u[i, i1] += w1
    return u


# ---------------------------------------------------------------------------
# Kernel 1: all pyramid branches fused
#   adaptive pool (stacked matmul, HW reduction) -> 1x1 conv -> BN -> ReLU
#   -> fold in the 3x3 fuse-conv branch weights (YW = concat_k Y @ Wu[k]).
#   grid = (N, n_row_tiles); row-tile axis is "arbitrary" (VMEM accumulator).
# ---------------------------------------------------------------------------
def _pool_branches_kernel(x_ref, p_ref, w_ref, scale_ref, bias_ref, mask_ref,
                          wu_ref, yw_ref, acc_ref):
    # x_ref   : (1, TR, Cin) bf16       row tile of flattened (zero-padded) input
    # p_ref   : (BTp, TR) bf16          stacked adaptive-pool matrix columns
    # w_ref   : (Cin, nb*Cout) bf16     all branch 1x1-conv weights side by side
    # scale/bias: (1, nb*Cout) f32      folded BN per branch
    # mask_ref: (BTp, nb*Cout) f32      block-diagonal (bin rows x branch cols)
    # wu_ref  : (9, nb*Cout, Cout) bf16 fuse-conv weights acting on the branches
    # yw_ref  : (1, 9*BTp, Cout) bf16   per-tap branch features folded with Wu
    # acc_ref : (BTp, Cin) f32 scratch  pooled-feature accumulator
    t = pl.program_id(1)

    @pl.when(t == 0)
    def _():
        acc_ref[...] = jnp.zeros_like(acc_ref)

    acc_ref[...] += jnp.dot(p_ref[...], x_ref[0],
                            preferred_element_type=jnp.float32)

    @pl.when(t == pl.num_programs(1) - 1)
    def _():
        y = jnp.dot(acc_ref[...].astype(jnp.bfloat16), w_ref[...],
                    preferred_element_type=jnp.float32)
        # mask AFTER bias + ReLU: zeroes cross-branch columns and padded bins.
        y = jnp.maximum(y * scale_ref[...] + bias_ref[...], 0.0) * mask_ref[...]
        yb = y.astype(jnp.bfloat16)
        yw = jnp.concatenate(
            [jnp.dot(yb, wu_ref[k], preferred_element_type=jnp.float32)
             for k in range(9)], axis=0)
        yw_ref[0] = yw.astype(yw_ref.dtype)


# ---------------------------------------------------------------------------
# Kernel 2: row-tiled 3x3 fuse conv (pad=1) + BN + ReLU.
#   Branch path: one matmul  U_all_tile @ YW  (upsample + all taps folded).
#   Direct path: manual halo DMA of padded x, 3 matmuls with K = 3*Cin.
#   grid = (N, n_row_tiles), both axes "parallel".
# ---------------------------------------------------------------------------
def _make_fuse_kernel(TH, W, c_in, c_out):
    def fuse_kernel(x_hbm, yw_ref, u_ref, wx_ref, scale_ref, bias_ref,
                    o_ref, xbuf, sem, acc_ref):
        # x_hbm   : (N, Hp+2, W+2, Cin) bf16 in HBM (memory_space=ANY)
        # yw_ref  : (1, 9*BTp, Cout) bf16
        # u_ref   : (TH*W, 9*BTp) bf16    shifted-upsample operator rows, this tile
        # wx_ref  : (3, 3*Cin, Cout) bf16 dx-stacked direct conv weights per dy
        # o_ref   : (1, TH*W, Cout) f32
        # xbuf    : (TH+2, W+2, Cin) bf16 VMEM scratch (halo slab)
        # acc_ref : (TH*W, Cout) f32 VMEM scratch
        n = pl.program_id(0)
        t = pl.program_id(1)

        # --- manual 1-row-halo DMA of the padded input rows for this tile ---
        # TODO(synk): double-buffer this DMA to overlap with the matmuls below.
        cp = pltpu.make_async_copy(x_hbm.at[n, pl.ds(t * TH, TH + 2)], xbuf, sem)
        cp.start()
        cp.wait()

        # --- branch path: single K = 9*BTp matmul (no halo needed: spatial
        #     shifts are baked into the U_all columns) ---
        acc_ref[...] = jnp.dot(u_ref[...], yw_ref[0],
                               preferred_element_type=jnp.float32)

        # --- direct path: 3 matmuls, one per row shift, K = 3*Cin ---
        # TODO(synk): eliminate the dx-stacking copies via pltpu.roll / layout.
        xp = xbuf[...]
        for dy in range(3):
            rows = xp[dy:dy + TH]                                # (TH, W+2, Cin)
            patch = jnp.concatenate(
                [rows[:, 0:W, :], rows[:, 1:W + 1, :], rows[:, 2:W + 2, :]],
                axis=-1).reshape(TH * W, 3 * c_in)
            acc_ref[...] += jnp.dot(patch, wx_ref[dy],
                                    preferred_element_type=jnp.float32)

        out = jnp.maximum(acc_ref[...] * scale_ref[...] + bias_ref[...], 0.0)
        o_ref[0] = out.astype(o_ref.dtype)

    return fuse_kernel


# ---------------------------------------------------------------------------
# Module
# ---------------------------------------------------------------------------
class PyramidPoolingModulePallas:
    def __init__(self, in_channels, out_channels, bin_sizes,
                 align_corners=False, eps=1e-5, seed=0):
        self.in_channels = in_channels
        self.out_channels = out_channels
        self.bin_sizes = tuple(bin_sizes)
        self.align_corners = align_corners
        nb = len(self.bin_sizes)

        key = jax.random.PRNGKey(seed)
        keys = jax.random.split(key, 2 * nb + 2)

        # ---- Branch params: Conv2d(in, out, 1, bias=False) + BN (stats folded) ----
        self.branch_w, self.branch_scale, self.branch_bias = [], [], []
        for i, _b in enumerate(self.bin_sizes):
            w = 0.1 * jax.random.normal(keys[2 * i], (out_channels, in_channels),
                                        jnp.float32)
            gamma = 1.0 + 0.1 * jax.random.normal(keys[2 * i + 1], (out_channels,),
                                                  jnp.float32)
            beta = 0.05 * jnp.arange(out_channels, dtype=jnp.float32)
            mean = jnp.zeros((out_channels,), jnp.float32)
            var = jnp.ones((out_channels,), jnp.float32)
            scale = gamma / jnp.sqrt(var + eps)
            bias = beta - mean * scale
            self.branch_w.append(jnp.transpose(w))                   # (Cin, Cout)
            self.branch_scale.append(scale.reshape(1, out_channels))
            self.branch_bias.append(bias.reshape(1, out_channels))

        # ---- Stacked branch params (single fused pool kernel) ----
        self.bin_total = int(sum(b * b for b in self.bin_sizes))
        self.bt_pad = _round_up(self.bin_total, 8)          # sublane-aligned bins
        self.bin_offsets = np.cumsum([0] + [b * b for b in self.bin_sizes])
        self.w_cat = jnp.concatenate(self.branch_w, axis=1)           # (Cin, nb*Cout)
        self.scale_cat = jnp.concatenate(self.branch_scale, axis=1)   # (1, nb*Cout)
        self.bias_cat = jnp.concatenate(self.branch_bias, axis=1)
        mask = np.zeros((self.bt_pad, nb * out_channels), np.float32)
        for i in range(nb):
            mask[self.bin_offsets[i]:self.bin_offsets[i + 1],
                 i * out_channels:(i + 1) * out_channels] = 1.0
        self.block_mask = jnp.asarray(mask)                           # (BTp, nb*Cout)

        # ---- Fuse params: Conv2d(in + out*nb, out, 3, pad=1, bias=False) + BN ----
        self.c_total = in_channels + out_channels * nb
        wf = 0.05 * jax.random.normal(keys[-2], (out_channels, self.c_total, 3, 3),
                                      jnp.float32)
        self.fuse_w_hwio = jnp.transpose(wf, (2, 3, 1, 0))   # (3, 3, Ctot, Cout)
        # direct-path weights, dx-stacked per dy: (3, 3*Cin, Cout)
        self.fuse_wx_rows = self.fuse_w_hwio[:, :, :in_channels, :].reshape(
            3, 3 * in_channels, out_channels)
        # branch-path weights per tap k = dy*3+dx: (9, nb*Cout, Cout)
        self.fuse_wu = self.fuse_w_hwio[:, :, in_channels:, :].reshape(
            9, out_channels * nb, out_channels)
        gamma = 1.0 + 0.1 * jax.random.normal(keys[-1], (out_channels,), jnp.float32)
        beta = 0.02 * jnp.arange(out_channels, dtype=jnp.float32)
        scale = gamma / jnp.sqrt(1.0 + eps)
        self.fuse_scale = scale.reshape(1, out_channels)
        self.fuse_bias = (beta - 0.0 * scale).reshape(1, out_channels)

        # bf16 copies of all matmul operands (f32 accum / epilogue kept).
        self.w_cat_b = self.w_cat.astype(jnp.bfloat16)
        self.fuse_wx_b = self.fuse_wx_rows.astype(jnp.bfloat16)
        self.fuse_wu_b = self.fuse_wu.astype(jnp.bfloat16)

        self.vmem_limit = _vmem_limit_bytes()
        self._spatial_cache = {}   # (H, W) -> dict of operators & tile sizes

    # ---- cached, host-built spatial operators + tile-size choices ----
    def _spatial_operators(self, H, W):
        key = (H, W)
        if key in self._spatial_cache:
            return self._spatial_cache[key]

        BT, BTp = self.bin_total, self.bt_pad
        C, Cout = self.in_channels, self.out_channels
        HW = H * W
        budget = self.vmem_limit // 6

        # ---- kernel-1 row tile TR (lane-aligned, budget-derived, HW padded) ----
        tr_cap = budget // (4 * (C + BTp) * 2)          # bf16, double-buffered
        tr_max = max(128, min(2048, (tr_cap // 128) * 128))
        TR = min(tr_max, _round_up(HW, 128))
        HWp = _round_up(HW, TR)

        # ---- kernel-2 row tile TH (full W, 1-row halo) ----
        TH = None
        for cand in (4, 8, 16, 32):
            if cand > max(1, H // 2) or (cand * W) % 8 != 0:
                continue
            xb = (cand + 2) * (W + 2) * C * 2
            ub = 2 * cand * W * (9 * BTp) * 2
            ob = cand * W * Cout * (4 + 2 * 4)
            if xb + ub + ob <= budget:
                TH = cand
        if TH is None:
            TH = H                                       # single full-image tile
        Hp = _round_up(H, TH)

        # ---- stacked adaptive-pool operator, padded to (BTp, HWp) ----
        p_blocks = [np.kron(_adaptive_pool_matrix(H, b), _adaptive_pool_matrix(W, b))
                    for b in self.bin_sizes]
        p_stack = np.concatenate(p_blocks, axis=0).astype(np.float32)  # (BT, HW)
        p_pad = np.zeros((BTp, HWp), np.float32)
        p_pad[:BT, :HW] = p_stack

        # ---- shifted bilinear-upsample operators, stacked over the 9 taps ----
        u_blocks = [np.kron(_bilinear_matrix(H, b, self.align_corners),
                            _bilinear_matrix(W, b, self.align_corners))
                    for b in self.bin_sizes]
        u_stack = np.concatenate(u_blocks, axis=1).astype(np.float32)  # (HW, BT)
        u_img = np.zeros((H, W, BTp), np.float32)
        u_img[:, :, :BT] = u_stack.reshape(H, W, BT)
        u_taps = np.zeros((9, H, W, BTp), np.float32)
        for k in range(9):
            oy, ox = k // 3 - 1, k % 3 - 1
            ys0, ys1 = max(0, -oy), min(H, H - oy)
            xs0, xs1 = max(0, -ox), min(W, W - ox)
            u_taps[k, ys0:ys1, xs0:xs1, :] = \
                u_img[ys0 + oy:ys1 + oy, xs0 + ox:xs1 + ox, :]
        u_all = np.transpose(u_taps.reshape(9, HW, BTp), (1, 0, 2)).reshape(
            HW, 9 * BTp)
        if Hp > H:
            u_all = np.pad(u_all, ((0, (Hp - H) * W), (0, 0)))

        ops = dict(
            p=jnp.asarray(p_pad).astype(jnp.bfloat16),
            u=jnp.asarray(u_all).astype(jnp.bfloat16),
            TR=TR, HWp=HWp, TH=TH, Hp=Hp)
        self._spatial_cache[key] = ops
        return ops

    def __call__(self, x):
        # x: NCHW (PyTorch convention)
        N, C, H, W = x.shape
        assert C == self.in_channels
        Cout = self.out_channels
        nb = len(self.bin_sizes)
        nbF = Cout * nb
        BTp = self.bt_pad
        BT9 = 9 * BTp
        HW = H * W

        ops = self._spatial_operators(H, W)
        TR, HWp, TH, Hp = ops["TR"], ops["HWp"], ops["TH"], ops["Hp"]
        nT = HWp // TR
        nHT = Hp // TH

        x_nhwc = jnp.transpose(x, (0, 2, 3, 1)).astype(jnp.float32)    # (N,H,W,C)
        x_flat = x_nhwc.reshape(N, HW, C)
        if HWp > HW:
            x_flat = jnp.pad(x_flat, ((0, 0), (0, HWp - HW), (0, 0)))
        x_flat = x_flat.astype(jnp.bfloat16)
        # TODO(synk): synthesize this 1px halo inside kernel 2 instead of
        # writing a padded bf16 copy of x to HBM.
        x_pad = jnp.pad(x_nhwc, ((0, 0), (1, 1 + Hp - H), (1, 1), (0, 0)))
        x_pad = x_pad.astype(jnp.bfloat16)                 # (N, Hp+2, W+2, C)

        cp_pool = pltpu.CompilerParams(
            dimension_semantics=("parallel", "arbitrary"),
            vmem_limit_bytes=self.vmem_limit)
        cp_fuse = pltpu.CompilerParams(
            dimension_semantics=("parallel", "parallel"),
            vmem_limit_bytes=self.vmem_limit)

        # ---- Kernel 1: pool + 1x1 conv + BN + ReLU + Wu fold ----
        yw = pl.pallas_call(
            _pool_branches_kernel,
            out_shape=jax.ShapeDtypeStruct((N, BT9, Cout), jnp.bfloat16),
            grid=(N, nT),
            in_specs=[
                pl.BlockSpec((1, TR, C), lambda n, t: (n, t, 0)),
                pl.BlockSpec((BTp, TR), lambda n, t: (0, t)),
                pl.BlockSpec((C, nbF), lambda n, t: (0, 0)),
                pl.BlockSpec((1, nbF), lambda n, t: (0, 0)),
                pl.BlockSpec((1, nbF), lambda n, t: (0, 0)),
                pl.BlockSpec((BTp, nbF), lambda n, t: (0, 0)),
                pl.BlockSpec((9, nbF, Cout), lambda n, t: (0, 0, 0)),
            ],
            out_specs=pl.BlockSpec((1, BT9, Cout), lambda n, t: (n, 0, 0)),
            scratch_shapes=[pltpu.VMEM((BTp, C), jnp.float32)],
            compiler_params=cp_pool,
        )(x_flat, ops["p"], self.w_cat_b, self.scale_cat, self.bias_cat,
          self.block_mask, self.fuse_wu_b)

        # ---- Kernel 2: row-tiled 3x3 fuse conv + BN + ReLU ----
        fuse_kernel = _make_fuse_kernel(TH, W, C, Cout)
        out = pl.pallas_call(
            fuse_kernel,
            out_shape=jax.ShapeDtypeStruct((N, Hp * W, Cout), jnp.float32),
            grid=(N, nHT),
            in_specs=[
                pl.BlockSpec(memory_space=pl.ANY),                     # x_pad (HBM)
                pl.BlockSpec((1, BT9, Cout), lambda n, t: (n, 0, 0)),
                pl.BlockSpec((TH * W, BT9), lambda n, t: (t, 0)),
                pl.BlockSpec((3, 3 * C, Cout), lambda n, t: (0, 0, 0)),
                pl.BlockSpec((1, Cout), lambda n, t: (0, 0)),
                pl.BlockSpec((1, Cout), lambda n, t: (0, 0)),
            ],
            out_specs=pl.BlockSpec((1, TH * W, Cout), lambda n, t: (n, t, 0)),
            scratch_shapes=[
                pltpu.VMEM((TH + 2, W + 2, C), jnp.bfloat16),
                pltpu.SemaphoreType.DMA,
                pltpu.VMEM((TH * W, Cout), jnp.float32),
            ],
            compiler_params=cp_fuse,
        )(x_pad, yw, ops["u"], self.fuse_wx_b, self.fuse_scale, self.fuse_bias)

        out = out[:, :HW, :].reshape(N, H, W, Cout)
        return jnp.transpose(out, (0, 3, 1, 2))                         # NCHW


# ---------------------------------------------------------------------------
# Pure-JAX f32 reference (independent of the kernel factorization)
# ---------------------------------------------------------------------------
def reference_forward(m, x):
    N, C, H, W = x.shape
    F_out = m.out_channels
    xh = jnp.transpose(x, (0, 2, 3, 1)).astype(jnp.float32)
    xf = xh.reshape(N, H * W, C)
    lvls = [xh]
    for i, b in enumerate(m.bin_sizes):
        p2 = jnp.asarray(np.kron(_adaptive_pool_matrix(H, b),
                                 _adaptive_pool_matrix(W, b)))
        u2 = jnp.asarray(np.kron(_bilinear_matrix(H, b, m.align_corners),
                                 _bilinear_matrix(W, b, m.align_corners)))
        pooled = jnp.einsum('bp,npc->nbc', p2, xf)
        y = jnp.einsum('nbc,co->nbo', pooled, m.branch_w[i])
        y = jnp.maximum(y * m.branch_scale[i] + m.branch_bias[i], 0.0)
        up = jnp.einsum('pb,nbo->npo', u2, y)
        lvls.append(up.reshape(N, H, W, F_out))
    cat = jnp.concatenate(lvls, axis=-1)
    out = jax.lax.conv_general_dilated(
        cat, m.fuse_w_hwio, window_strides=(1, 1), padding='SAME',
        dimension_numbers=('NHWC', 'HWIO', 'NHWC'))
    out = jnp.maximum(out * m.fuse_scale.reshape(1, 1, 1, -1)
                      + m.fuse_bias.reshape(1, 1, 1, -1), 0.0)
    return jnp.transpose(out, (0, 3, 1, 2))


if __name__ == "__main__":
    in_channels, out_channels = 4, 8
    bin_sizes = (1, 2, 3, 6)
    N, H, W = 2, 16, 16

    x = jax.random.normal(jax.random.PRNGKey(0), (N, in_channels, H, W), jnp.float32)

    ppm = PyramidPoolingModulePallas(in_channels, out_channels, bin_sizes,
                                     align_corners=False, seed=0)

    out = ppm(x)
    out = jax.block_until_ready(out)

    assert out.shape == (N, out_channels, H, W), out.shape
    assert bool(jnp.all(jnp.isfinite(out)))

    ref = jax.block_until_ready(reference_forward(ppm, x))
    # bf16 matmul operands (f32 accumulation) -> looser tolerance than pure f32.
    assert bool(jnp.allclose(out, ref, atol=3e-2, rtol=3e-2)), \
        float(jnp.max(jnp.abs(out - ref)))

    print("KERNEL_OK")
</pallas_src>

<mosaic_0001>
module attributes {stable_mosaic.version = 11 : i64} {
  func.func @_pool_branches_kernel(%arg0: i32, %arg1: i32, %arg2: memref<1x256x4xbf16, #tpu.memory_space<vmem>>, %arg3: memref<56x256xbf16, #tpu.memory_space<vmem>>, %arg4: memref<4x32xbf16, #tpu.memory_space<vmem>>, %arg5: memref<1x32xf32, #tpu.memory_space<vmem>>, %arg6: memref<1x32xf32, #tpu.memory_space<vmem>>, %arg7: memref<56x32xf32, #tpu.memory_space<vmem>>, %arg8: memref<9x32x8xbf16, #tpu.memory_space<vmem>>, %arg9: memref<1x504x8xbf16, #tpu.memory_space<vmem>>, %arg10: memref<56x4xf32, #tpu.memory_space<vmem>>) attributes {dimension_semantics = [#tpu.dimension_semantics<parallel>, #tpu.dimension_semantics<arbitrary>], iteration_bounds = array<i64: 2, 1>, scalar_prefetch = 0 : i64, scratch_operands = 1 : i64, tpu.core_type = #tpu.core_type<tc>, window_params = [{transform_indices = @transform_0, window_bounds = array<i64: 1, 256, 4>}, {transform_indices = @transform_1, window_bounds = array<i64: 56, 256>}, {pipeline_mode = #tpu.pipeline_mode<synchronous>, transform_indices = @transform_2, window_bounds = array<i64: 4, 32>}, {pipeline_mode = #tpu.pipeline_mode<synchronous>, transform_indices = @transform_3, window_bounds = array<i64: 1, 32>}, {pipeline_mode = #tpu.pipeline_mode<synchronous>, transform_indices = @transform_4, window_bounds = array<i64: 1, 32>}, {pipeline_mode = #tpu.pipeline_mode<synchronous>, transform_indices = @transform_5, window_bounds = array<i64: 56, 32>}, {pipeline_mode = #tpu.pipeline_mode<synchronous>, transform_indices = @transform_6, window_bounds = array<i64: 9, 32, 8>}, {transform_indices = @transform_7, window_bounds = array<i64: 1, 504, 8>}]} {
    %c0_i32 = arith.constant 0 : i32
    %0 = arith.cmpi eq, %arg1, %c0_i32 : i32
    %1 = arith.extui %0 : i1 to i32
    %c0_i32_0 = arith.constant 0 : i32
    %2 = arith.cmpi ne, %1, %c0_i32_0 : i32
    scf.if %2 {
      %cst_11 = arith.constant 0.000000e+00 : f32
      %13 = vector.broadcast %cst_11 : f32 to vector<56x4xf32>
      %c0_12 = arith.constant 0 : index
      %c0_13 = arith.constant 0 : index
      %14 = vector.load %arg10[%c0_12, %c0_13] : memref<56x4xf32, #tpu.memory_space<vmem>>, vector<56x4xf32>
      tpu.vector_store %arg10[%c0_12, %c0_13], %13 {strides = array<i32>} : memref<56x4xf32, #tpu.memory_space<vmem>>, vector<56x4xf32>,
    } else {
    }
    %c0 = arith.constant 0 : index
    %c0_1 = arith.constant 0 : index
    %3 = vector.load %arg10[%c0, %c0_1] : memref<56x4xf32, #tpu.memory_space<vmem>>, vector<56x4xf32>
    %c0_2 = arith.constant 0 : index
    %c0_3 = arith.constant 0 : index
    %4 = vector.load %arg3[%c0_2, %c0_3] : memref<56x256xbf16, #tpu.memory_space<vmem>>, vector<56x256xbf16>
    %c0_4 = arith.constant 0 : index
    %c0_5 = arith.constant 0 : index
    %c0_6 = arith.constant 0 : index
    %5 = vector.load %arg2[%c0_4, %c0_5, %c0_6] : memref<1x256x4xbf16, #tpu.memory_space<vmem>>, vector<1x256x4xbf16>
    %6 = vector.shape_cast %5 : vector<1x256x4xbf16> to vector<256x4xbf16>
    %cst = arith.constant dense<0.000000e+00> : vector<56x4xf32>
    %7 = tpu.matmul %4, %6, %cst {dimension_numbers = #tpu.dot_dimension_numbers<[1], [0], [0], [1], [0, 0, 1, 1], [], []>} : vector<56x256xbf16>, vector<256x4xbf16>, vector<56x4xf32> -> vector<56x4xf32>
    %8 = arith.addf %3, %7 : vector<56x4xf32>
    %c0_7 = arith.constant 0 : index
    %c0_8 = arith.constant 0 : index
    %9 = vector.load %arg10[%c0_7, %c0_8] : memref<56x4xf32, #tpu.memory_space<vmem>>, vector<56x4xf32>
    tpu.vector_store %arg10[%c0_7, %c0_8], %8 {strides = array<i32>} : memref<56x4xf32, #tpu.memory_space<vmem>>, vector<56x4xf32>,
    %c0_i32_9 = arith.constant 0 : i32
    %10 = arith.cmpi eq, %arg1, %c0_i32_9 : i32
    %11 = arith.extui %10 : i1 to i32
    %c0_i32_10 = arith.constant 0 : i32
    %12 = arith.cmpi ne, %11, %c0_i32_10 : i32
    scf.if %12 {
      %c0_11 = arith.constant 0 : index
      %c0_12 = arith.constant 0 : index
      %13 = vector.load %arg10[%c0_11, %c0_12] : memref<56x4xf32, #tpu.memory_space<vmem>>, vector<56x4xf32>
      %14 = arith.truncf %13 : vector<56x4xf32> to vector<56x4xbf16>
      %c0_13 = arith.constant 0 : index
      %c0_14 = arith.constant 0 : index
      %15 = vector.load %arg4[%c0_13, %c0_14] : memref<4x32xbf16, #tpu.memory_space<vmem>>, vector<4x32xbf16>
      %cst_15 = arith.constant dense<0.000000e+00> : vector<56x32xf32>
      %16 = tpu.matmul %14, %15, %cst_15 {dimension_numbers = #tpu.dot_dimension_numbers<[1], [0], [0], [1], [0, 0, 1, 1], [], []>} : vector<56x4xbf16>, vector<4x32xbf16>, vector<56x32xf32> -> vector<56x32xf32>
      %c0_16 = arith.constant 0 : index
      %c0_17 = arith.constant 0 : index
      %17 = vector.load %arg5[%c0_16, %c0_17] : memref<1x32xf32, #tpu.memory_space<vmem>>, vector<1x32xf32>
      %18 = vector.broadcast %17 : vector<1x32xf32> to vector<56x32xf32>
      %19 = arith.mulf %16, %18 : vector<56x32xf32>
      %c0_18 = arith.constant 0 : index
      %c0_19 = arith.constant 0 : index
      %20 = vector.load %arg6[%c0_18, %c0_19] : memref<1x32xf32, #tpu.memory_space<vmem>>, vector<1x32xf32>
      %21 = vector.broadcast %20 : vector<1x32xf32> to vector<56x32xf32>
      %22 = arith.addf %19, %21 : vector<56x32xf32>
      %cst_20 = arith.constant 0.000000e+00 : f32
      %23 = vector.broadcast %cst_20 : f32 to vector<56x32xf32>
      %24 = arith.maximumf %22, %23 : vector<56x32xf32>
      %c0_21 = arith.constant 0 : index
      %c0_22 = arith.constant 0 : index
      %25 = vector.load %arg7[%c0_21, %c0_22] : memref<56x32xf32, #tpu.memory_space<vmem>>, vector<56x32xf32>
      %26 = arith.mulf %24, %25 : vector<56x32xf32>
      %27 = arith.truncf %26 : vector<56x32xf32> to vector<56x32xbf16>
      %c0_23 = arith.constant 0 : index
      %c0_24 = arith.constant 0 : index
      %c0_25 = arith.constant 0 : index
      %28 = vector.load %arg8[%c0_23, %c0_24, %c0_25] : memref<9x32x8xbf16, #tpu.memory_space<vmem>>, vector<1x32x8xbf16>
      %29 = vector.shape_cast %28 : vector<1x32x8xbf16> to vector<32x8xbf16>
      %cst_26 = arith.constant dense<0.000000e+00> : vector<56x8xf32>
      %30 = tpu.matmul %27, %29, %cst_26 {dimension_numbers = #tpu.dot_dimension_numbers<[1], [0], [0], [1], [0, 0, 1, 1], [], []>} : vector<56x32xbf16>, vector<32x8xbf16>, vector<56x8xf32> -> vector<56x8xf32>
      %c1 = arith.constant 1 : index
      %c0_27 = arith.constant 0 : index
      %c0_28 = arith.constant 0 : index
      %31 = vector.load %arg8[%c1, %c0_27, %c0_28] : memref<9x32x8xbf16, #tpu.memory_space<vmem>>, vector<1x32x8xbf16>
      %32 = vector.shape_cast %31 : vector<1x32x8xbf16> to vector<32x8xbf16>
      %cst_29 = arith.constant dense<0.000000e+00> : vector<56x8xf32>
      %33 = tpu.matmul %27, %32, %cst_29 {dimension_numbers = #tpu.dot_dimension_numbers<[1], [0], [0], [1], [0, 0, 1, 1], [], []>} : vector<56x32xbf16>, vector<32x8xbf16>, vector<56x8xf32> -> vector<56x8xf32>
      %c2 = arith.constant 2 : index
      %c0_30 = arith.constant 0 : index
      %c0_31 = arith.constant 0 : index
      %34 = vector.load %arg8[%c2, %c0_30, %c0_31] : memref<9x32x8xbf16, #tpu.memory_space<vmem>>, vector<1x32x8xbf16>
      %35 = vector.shape_cast %34 : vector<1x32x8xbf16> to vector<32x8xbf16>
      %cst_32 = arith.constant dense<0.000000e+00> : vector<56x8xf32>
      %36 = tpu.matmul %27, %35, %cst_32 {dimension_numbers = #tpu.dot_dimension_numbers<[1], [0], [0], [1], [0, 0, 1, 1], [], []>} : vector<56x32xbf16>, vector<32x8xbf16>, vector<56x8xf32> -> vector<56x8xf32>
      %c3 = arith.constant 3 : index
      %c0_33 = arith.constant 0 : index
      %c0_34 = arith.constant 0 : index
      %37 = vector.load %arg8[%c3, %c0_33, %c0_34] : memref<9x32x8xbf16, #tpu.memory_space<vmem>>, vector<1x32x8xbf16>
      %38 = vector.shape_cast %37 : vector<1x32x8xbf16> to vector<32x8xbf16>
      %cst_35 = arith.constant dense<0.000000e+00> : vector<56x8xf32>
      %39 = tpu.matmul %27, %38, %cst_35 {dimension_numbers = #tpu.dot_dimension_numbers<[1], [0], [0], [1], [0, 0, 1, 1], [], []>} : vector<56x32xbf16>, vector<32x8xbf16>, vector<56x8xf32> -> vector<56x8xf32>
      %c4 = arith.constant 4 : index
      %c0_36 = arith.constant 0 : index
      %c0_37 = arith.constant 0 : index
      %40 = vector.load %arg8[%c4, %c0_36, %c0_37] : memref<9x32x8xbf16, #tpu.memory_space<vmem>>, vector<1x32x8xbf16>
      %41 = vector.shape_cast %40 : vector<1x32x8xbf16> to vector<32x8xbf16>
      %cst_38 = arith.constant dense<0.000000e+00> : vector<56x8xf32>
      %42 = tpu.matmul %27, %41, %cst_38 {dimension_numbers = #tpu.dot_dimension_numbers<[1], [0], [0], [1], [0, 0, 1, 1], [], []>} : vector<56x32xbf16>, vector<32x8xbf16>, vector<56x8xf32> -> vector<56x8xf32>
      %c5 = arith.constant 5 : index
      %c0_39 = arith.constant 0 : index
      %c0_40 = arith.constant 0 : index
      %43 = vector.load %arg8[%c5, %c0_39, %c0_40] : memref<9x32x8xbf16, #tpu.memory_space<vmem>>, vector<1x32x8xbf16>
      %44 = vector.shape_cast %43 : vector<1x32x8xbf16> to vector<32x8xbf16>
      %cst_41 = arith.constant dense<0.000000e+00> : vector<56x8xf32>
      %45 = tpu.matmul %27, %44, %cst_41 {dimension_numbers = #tpu.dot_dimension_numbers<[1], [0], [0], [1], [0, 0, 1, 1], [], []>} : vector<56x32xbf16>, vector<32x8xbf16>, vector<56x8xf32> -> vector<56x8xf32>
      %c6 = arith.constant 6 : index
      %c0_42 = arith.constant 0 : index
      %c0_43 = arith.constant 0 : index
      %46 = vector.load %arg8[%c6, %c0_42, %c0_43] : memref<9x32x8xbf16, #tpu.memory_space<vmem>>, vector<1x32x8xbf16>
      %47 = vector.shape_cast %46 : vector<1x32x8xbf16> to vector<32x8xbf16>
      %cst_44 = arith.constant dense<0.000000e+00> : vector<56x8xf32>
      %48 = tpu.matmul %27, %47, %cst_44 {dimension_numbers = #tpu.dot_dimension_numbers<[1], [0], [0], [1], [0, 0, 1, 1], [], []>} : vector<56x32xbf16>, vector<32x8xbf16>, vector<56x8xf32> -> vector<56x8xf32>
      %c7 = arith.constant 7 : index
      %c0_45 = arith.constant 0 : index
      %c0_46 = arith.constant 0 : index
      %49 = vector.load %arg8[%c7, %c0_45, %c0_46] : memref<9x32x8xbf16, #tpu.memory_space<vmem>>, vector<1x32x8xbf16>
      %50 = vector.shape_cast %49 : vector<1x32x8xbf16> to vector<32x8xbf16>
      %cst_47 = arith.constant dense<0.000000e+00> : vector<56x8xf32>
      %51 = tpu.matmul %27, %50, %cst_47 {dimension_numbers = #tpu.dot_dimension_numbers<[1], [0], [0], [1], [0, 0, 1, 1], [], []>} : vector<56x32xbf16>, vector<32x8xbf16>, vector<56x8xf32> -> vector<56x8xf32>
      %c8 = arith.constant 8 : index
      %c0_48 = arith.constant 0 : index
      %c0_49 = arith.constant 0 : index
      %52 = vector.load %arg8[%c8, %c0_48, %c0_49] : memref<9x32x8xbf16, #tpu.memory_space<vmem>>, vector<1x32x8xbf16>
      %53 = vector.shape_cast %52 : vector<1x32x8xbf16> to vector<32x8xbf16>
      %cst_50 = arith.constant dense<0.000000e+00> : vector<56x8xf32>
      %54 = tpu.matmul %27, %53, %cst_50 {dimension_numbers = #tpu.dot_dimension_numbers<[1], [0], [0], [1], [0, 0, 1, 1], [], []>} : vector<56x32xbf16>, vector<32x8xbf16>, vector<56x8xf32> -> vector<56x8xf32>
      %55 = tpu.concatenate %30, %33, %36, %39, %42, %45, %48, %51, %54 in 0 : vector<56x8xf32>, vector<56x8xf32>, vector<56x8xf32>, vector<56x8xf32>, vector<56x8xf32>, vector<56x8xf32>, vector<56x8xf32>, vector<56x8xf32>, vector<56x8xf32> -> vector<504x8xf32>
      %56 = arith.truncf %55 : vector<504x8xf32> to vector<504x8xbf16>
      %c0_51 = arith.constant 0 : index
      %c0_52 = arith.constant 0 : index
      %c0_53 = arith.constant 0 : index
      %57 = vector.load %arg9[%c0_51, %c0_52, %c0_53] : memref<1x504x8xbf16, #tpu.memory_space<vmem>>, vector<1x504x8xbf16>
      %58 = vector.shape_cast %57 : vector<1x504x8xbf16> to vector<504x8xbf16>
      %59 = vector.shape_cast %56 : vector<504x8xbf16> to vector<1x504x8xbf16>
      tpu.vector_store %arg9[%c0_51, %c0_52, %c0_53], %59 {strides = array<i32>} : memref<1x504x8xbf16, #tpu.memory_space<vmem>>, vector<1x504x8xbf16>,
    } else {
    }
    return
  }
  func.func @transform_0(%arg0: i32, %arg1: i32) -> (i32, i32, i32) {
    %c0_i32 = arith.constant 0 : i32
    %c0_i32_0 = arith.constant 0 : i32
    return %arg0, %arg1, %c0_i32 : i32, i32, i32
  }
  func.func @transform_1(%arg0: i32, %arg1: i32) -> (i32, i32) {
    %c0_i32 = arith.constant 0 : i32
    %c0_i32_0 = arith.constant 0 : i32
    return %c0_i32, %arg1 : i32, i32
  }
  func.func @transform_2(%arg0: i32, %arg1: i32) -> (i32, i32) {
    %c0_i32 = arith.constant 0 : i32
    %c0_i32_0 = arith.constant 0 : i32
    %c0_i32_1 = arith.constant 0 : i32
    return %c0_i32, %c0_i32_0 : i32, i32
  }
  func.func @transform_3(%arg0: i32, %arg1: i32) -> (i32, i32) {
    %c0_i32 = arith.constant 0 : i32
    %c0_i32_0 = arith.constant 0 : i32
    %c0_i32_1 = arith.constant 0 : i32
    return %c0_i32, %c0_i32_0 : i32, i32
  }
  func.func @transform_4(%arg0: i32, %arg1: i32) -> (i32, i32) {
    %c0_i32 = arith.constant 0 : i32
    %c0_i32_0 = arith.constant 0 : i32
    %c0_i32_1 = arith.constant 0 : i32
    return %c0_i32, %c0_i32_0 : i32, i32
  }
  func.func @transform_5(%arg0: i32, %arg1: i32) -> (i32, i32) {
    %c0_i32 = arith.constant 0 : i32
    %c0_i32_0 = arith.constant 0 : i32
    %c0_i32_1 = arith.constant 0 : i32
    return %c0_i32, %c0_i32_0 : i32, i32
  }
  func.func @transform_6(%arg0: i32, %arg1: i32) -> (i32, i32, i32) {
    %c0_i32 = arith.constant 0 : i32
    %c0_i32_0 = arith.constant 0 : i32
    %c0_i32_1 = arith.constant 0 : i32
    %c0_i32_2 = arith.constant 0 : i32
    return %c0_i32, %c0_i32_0, %c0_i32_1 : i32, i32, i32
  }
  func.func @transform_7(%arg0: i32, %arg1: i32) -> (i32, i32, i32) {
    %c0_i32 = arith.constant 0 : i32
    %c0_i32_0 = arith.constant 0 : i32
    %c0_i32_1 = arith.constant 0 : i32
    return %arg0, %c0_i32, %c0_i32_0 : i32, i32, i32
  }
}

</mosaic_0001>

<bundles_post_ra>
// kernel: tpu_custom_call.1
= control target key start
LH: loop header
LB: loop body
LE: loop exit
PB: predicated region body
PF: predicated region fallthrough
CT: control target
= control target key end

     0   :  { %s1704_s24 = smov 0   ;;  %s1706_s25 = smov 0   ;;  %s2126_s0 = inlined_call_operand.vmem [shape: bf16[2,256,4], index: 0, kind: input, shape index: {}]   ;;  %s2127_s1 = inlined_call_operand.vmem [shape: bf16[56,256], index: 1, kind: input, shape index: {}]   ;;  %s2128_s2 = inlined_call_operand.vmem [shape: bf16[4,32], index: 2, kind: input, shape index: {}]   ;;  %s2129_s3 = inlined_call_operand.vmem [shape: f32[1,32], index: 3, kind: input, shape index: {}]   ;;  %s2130_s4 = inlined_call_operand.vmem [shape: f32[1,32], index: 4, kind: input, shape index: {}]   ;;  %s2131_s5 = inlined_call_operand.vmem [shape: f32[56,32], index: 5, kind: input, shape index: {}]   ;;  %s2132_s6 = inlined_call_operand.vmem [shape: bf16[9,32,8], index: 6, kind: input, shape index: {}]   ;;  %s2133_s7 = inlined_call_operand.vmem [shape: bf16[2,504,8], index: 7, kind: output, shape index: {}]  }
   0x1   :  { %s1708_s26 = smov 0  }
   0x2 LB: > { %s29_s27 = sadd.s32 1, %s1657_s25  ;;  %p1332_p0 = scmp.ge.s32.totalorder %s1661_s26, 1  ;;  %s1661_s26 = sphi %s1708_s26, %s17_s26   ;;  %s1657_s25 = sphi %s1706_s25, %s2135_s25   ;;  %s1653_s24 = sphi %s1704_s24, %s2134_s24  }
   0x3   : > { %p31_p1 = scmp.ge.s32.totalorder %s29_s27, 2  ;;  %p267_p2 = scmp.lt.s32.totalorder %s1661_s26, 3 }
   0x5   : > { %s2137_s27 = smov (%p31_p1, %s29_s27), 0  ;;  %p268_p3 = pnand %p1332_p0, %p267_p2 }
   0x6   : > { %p309_p4 = scmp.lt.s32.totalorder (!%p268_p3), %s1653_s24, 1 }
   0x7   : > { %271 = sbr.rel (%p268_p3) target bundleno = 662 (0x296), region = 48 }
   0xc   : > { %s2139_s24 = smov (!%p309_p4, %s1653_s24), 1  ;;  %v1338_v14 = vld [vmem:[%s2127_s1] sm:$0xf]  ;;  %v1572_v15 = vld [vmem:[%s2127_s1 + $0x4] sm:$0xf0]  ;;  %v355_v34 = vld [vmem:[%s2127_s1 + $0x30] sm:$0xff] }
   0xd   : > { %s1570_s28 = sshll.u32 %s2139_s24, 7  ;;  %v1571_v16 = vld [vmem:[%s2127_s1 + $0x4] sm:$0xf]  ;;  %v1340_v19 = vld [vmem:[%s2127_s1 + $0x8] sm:$0xf0]  ;;  %v1339_v20 = vor.u32 %v1572_v15, %v1338_v14  ;;  %v407_v35 = vunpack.c.l.b16 %v355_v34  ;;  %v408_v36 = vunpack.c.h.b16 %v355_v34  ;;  %vm334_vm0 = vcmask 31744  }
   0xe   : > { %s1728_s8 = scalar_lea.vmem %s2126_s0, %s1570_s28  ;;  %v1343_v21 = vor.u32 %v1571_v16, %v1340_v19  ;;  %v1346_v22 = vld [vmem:[%s2127_s1 + $0x10] sm:$0xf]  ;;  %v1574_v23 = vld [vmem:[%s2127_s1 + $0x14] sm:$0xf0]  ;;  %v1573_v24 = vld [vmem:[%s2127_s1 + $0x14] sm:$0xf] }
   0xf   : > { %v1584_v0 = vld [vmem:[%s1728_s8 + $0x38] sm:$0xff]  ;;  %v1583_v2 = vld [vmem:[%s1728_s8 + $0x30] sm:$0xff]  ;;  %v1582_v4 = vld [vmem:[%s1728_s8 + $0x28] sm:$0xff]  ;;  %v1347_v26 = vor.u32 %v1574_v23, %v1346_v22  ;;  %v415_v37 = vpack.c.b16 %v407_v35, %v407_v35  ;;  %v416_v38 = vpack.c.b16 %v408_v36, %v408_v36  ;;  %v1663_v39 = vmov 0.0   ;;  %s1611_s15 = smul.u32 252, %s2139_s24 }
  0x10   : > { %v1592_v1 = vld [vmem:[%s1728_s8 + $0x78] sm:$0xff]  ;;  %521 = vmatpush.bf16.msra.mxu0 %v1584_v0  ;;  %v1591_v3 = vld [vmem:[%s1728_s8 + $0x70] sm:$0xff]  ;;  %v1590_v5 = vld [vmem:[%s1728_s8 + $0x68] sm:$0xff]  ;;  %335 = vst.msk [vmem:[#allocation2] sm:$0xff] %vm334_vm0, %v1663_v39  ;;  %vm619_vm1 = vcmask 1041408   ;;  %vm714_vm2 = vcmask 261120  }
  0x11   : > { %549 = vmatpush.bf16.msra.mxu1 %v1592_v1  ;;  %v1581_v6 = vld [vmem:[%s1728_s8 + $0x20] sm:$0xff]  ;;  %v1580_v8 = vld [vmem:[%s1728_s8 + $0x18] sm:$0xff]  ;;  %v1579_v10 = vld [vmem:[%s1728_s8 + $0x10] sm:$0xff]  ;;  %336 = vst.msk [vmem:[#allocation2 + $0x8] sm:$0xff] %vm334_vm0, %v1663_v39  ;;  %s1981_s18 = scalar_lea.vmem %s2133_s7, %s1611_s15  ;;  %vm1178_vm3 = vcmask 60416  }
  0x12   : > { %v1589_v7 = vld [vmem:[%s1728_s8 + $0x60] sm:$0xff]  ;;  %v1588_v9 = vld [vmem:[%s1728_s8 + $0x58] sm:$0xff]  ;;  %v1587_v11 = vld [vmem:[%s1728_s8 + $0x50] sm:$0xff]  ;;  %337 = vst.msk [vmem:[#allocation2 + $0x10] sm:$0xff] %vm334_vm0, %v1663_v39 }
  0x13   : > { %v1578_v12 = vld [vmem:[%s1728_s8 + $0x8] sm:$0xff]  ;;  %v1577_v17 = vld [vmem:[%s1728_s8] sm:$0xff]  ;;  %v1348_v25 = vld [vmem:[%s2127_s1 + $0x18] sm:$0xf0]  ;;  %338 = vst.msk [vmem:[#allocation2 + $0x18] sm:$0xff] %vm334_vm0, %v1663_v39 }
  0x14   : > { %522 = vmatpush.bf16.msra.mxu0 %v1583_v2  ;;  %v1586_v13 = vld [vmem:[%s1728_s8 + $0x48] sm:$0xff]  ;;  %v1585_v18 = vld [vmem:[%s1728_s8 + $0x40] sm:$0xff]  ;;  %v1351_v27 = vor.u32 %v1573_v24, %v1348_v25  ;;  %339 = vst.msk [vmem:[#allocation2 + $0x20] sm:$0xff] %vm334_vm0, %v1663_v39 }
  0x15   : > { %550 = vmatpush.bf16.msra.mxu1 %v1591_v3  ;;  %v1354_v28 = vld [vmem:[%s2127_s1 + $0x20] sm:$0xf]  ;;  %v1576_v29 = vld [vmem:[%s2127_s1 + $0x24] sm:$0xf0]  ;;  %v1575_v30 = vld [vmem:[%s2127_s1 + $0x24] sm:$0xf] }
  0x16   : > { %v1356_v31 = vld [vmem:[%s2127_s1 + $0x28] sm:$0xf0]  ;;  %v1355_v32 = vor.u32 %v1576_v29, %v1354_v28  ;;  %340 = vst.msk [vmem:[#allocation2 + $0x28] sm:$0xff] %vm334_vm0, %v1663_v39  ;;  %v606_v40 = vld [vmem:[%s2128_s2] sm:$0x3]  ;;  %v1600_v28 = vld [vmem:[%s2132_s6 + $0x38] sm:$0xff] }
  0x17   : > { %v1359_v33 = vor.u32 %v1575_v30, %v1356_v31  ;;  %341 = vst.msk [vmem:[#allocation2 + $0x30] sm:$0xff] %vm334_vm0, %v1663_v39  ;;  %v621_v41 = vsel %vm619_vm1, %v606_v40, 0  ;;  %v342_v43 = vld [vmem:[#allocation2] sm:$0xff]  ;;  %v1602_v29 = vld [vmem:[%s2132_s6 + $0x48] sm:$0xff]  ;;  %v1595_v31 = vld [vmem:[%s2132_s6 + $0x10] sm:$0xff] }
  0x18   : > { %523 = vmatpush.bf16.msra.mxu0 %v1582_v4  ;;  %630 = vmatpush.bf16.msra.mxu2 %v621_v41  ;;  %v343_v48 = vld [vmem:[#allocation2 + $0x8] sm:$0xff]  ;;  %v1593_v30 = vld [vmem:[%s2132_s6] sm:$0xff] }
  0x19   : > { %551 = vmatpush.bf16.msra.mxu1 %v1590_v5  ;;  %v344_v53 = vld [vmem:[#allocation2 + $0x10] sm:$0xff]  ;;  %v1598_v34 = vld [vmem:[%s2132_s6 + $0x28] sm:$0xff]  ;;  %v1836_v35 = vld [vmem:[%s2129_s3] ss:$0 sm:$0xff] }
  0x1a   : > { %v345_v61 = vld [vmem:[#allocation2 + $0x18] sm:$0xff] }
  0x1b   : > { %v346_v2 = vld [vmem:[#allocation2 + $0x20] sm:$0xff] }
  0x1c   : > { %524 = vmatpush.bf16.msra.mxu0 %v1581_v6 }
  0x1d   : > { %552 = vmatpush.bf16.msra.mxu1 %v1589_v7 }
  0x1e   : > { %v348_v15 = vld [vmem:[#allocation2 + $0x30] sm:$0xff] }
  0x20   : > { %525 = vmatpush.bf16.msra.mxu0 %v1580_v8 }
  0x21   : > { %553 = vmatpush.bf16.msra.mxu1 %v1588_v9 }
  0x24   : > { %526 = vmatpush.bf16.msra.mxu0 %v1579_v10  ;;  %v347_v10 = vld [vmem:[#allocation2 + $0x28] sm:$0xff] }
  0x25   : > { %554 = vmatpush.bf16.msra.mxu1 %v1587_v11 }
  0x28   : > { %527 = vmatpush.bf16.msra.mxu0 %v1578_v12 }
  0x29   : > { %555 = vmatpush.bf16.msra.mxu1 %v1586_v13 }
  0x2c   : > { %528 = vmatpush.bf16.msra.mxu0 %v1577_v17 }
  0x2d   : > { %556 = vmatpush.bf16.msra.mxu1 %v1585_v18 }
  0x2f   : > { %529 = vmatmul.bf16.vlgmr.msra.gmra.mxu0 %v1339_v20 }
  0x30   : > { %557 = vmatmul.bf16.vlgmr.msra.gmra.mxu1 %v1343_v21  ;;  %868 = vmatpush.bf16.msrb.mxu0 %v1600_v28  ;;  %v1605_v28 = vld [vmem:[%s2132_s6 + $0x60] sm:$0xff] }
  0x31   : > { %913 = vmatpush.bf16.msrb.mxu1 %v1602_v29 }
  0x3f   : > { %534 = vmatmul.bf16.gmra.mxu0 %v1347_v26  ;;  %v1594_v26 = vld [vmem:[%s2132_s6 + $0x8] sm:$0xff] }
  0x40   : > { %562 = vmatmul.bf16.gmra.mxu1 %v1351_v27  ;;  %v1596_v27 = vld [vmem:[%s2132_s6 + $0x18] sm:$0xff]  ;;  %733 = vmatpush.bf16.msra.mxu3 %v1594_v26 }
  0x41   : > { %778 = vmatpush.bf16.msrb.mxu2 %v1596_v27 }
  0x44   : > { %734 = vmatpush.bf16.msra.mxu3 %v1593_v30 }
  0x45   : > { %779 = vmatpush.bf16.msrb.mxu2 %v1595_v31 }
  0x48   : > { %823 = vmatpush.bf16.msrb.mxu3 %v1598_v34 }
  0x4f   : > { %539 = vmatmul.bf16.gmra.mxu0 %v1355_v32  ;;  %v1599_v32 = vld [vmem:[%s2132_s6 + $0x30] sm:$0xff] }
  0x50   : > { %567 = vmatmul.bf16.gmra.mxu1 %v1359_v33  ;;  %v1601_v33 = vld [vmem:[%s2132_s6 + $0x40] sm:$0xff]  ;;  %869 = vmatpush.bf16.msrb.mxu0 %v1599_v32 }
  0x51   : > { %914 = vmatpush.bf16.msrb.mxu1 %v1601_v33 }
  0x5f   : > { %544 = vmatmul.bf16.gmra.mxu0 %v415_v37 }
  0x60   : > { %572 = vmatmul.bf16.gmra.mxu1 %v416_v38  ;;  %v1842_v38 = vld [vmem:[%s2130_s4] ss:$0 sm:$0xff] }
  0xac   : > { %v530_v42 = vpop.f32.mrf.mxu0 }
  0xad   : > { %v558_v44 = vpop.f32.mrf.mxu1 }
  0xae   : > { %v559_v45 = vadd.f32 %v558_v44, %v530_v42  ;;  %v680_v44 = vld [vmem:[%s2131_s5] sm:$0xff] }
  0xb0   : > { %v577_v46 = vadd.f32 %v559_v45, %v342_v43  ;;  %v681_v45 = vld [vmem:[%s2131_s5 + $0x8] sm:$0xff] }
  0xb2   : > { %585 = vst.msk [vmem:[#allocation2] sm:$0xff] %vm334_vm0, %v577_v46 }
  0xb4   : > { %v532_v47 = vpop.f32.mrf.mxu0 }
  0xb5   : > { %v560_v49 = vpop.f32.mrf.mxu1 }
  0xb6   : > { %v561_v50 = vadd.f32 %v560_v49, %v532_v47 }
  0xb8   : > { %v578_v51 = vadd.f32 %v561_v50, %v343_v48 }
  0xb9   : > { %v595_v57 = vld [vmem:[#allocation2] sm:$0xff] }
  0xba   : > { %586 = vst.msk [vmem:[#allocation2 + $0x8] sm:$0xff] %vm334_vm0, %v578_v51 }
  0xbc   : > { %v535_v52 = vpop.f32.mrf.mxu0 }
  0xbd   : > { %v563_v54 = vpop.f32.mrf.mxu1 }
  0xbe   : > { %v564_v55 = vadd.f32 %v563_v54, %v535_v52 }
  0xc0   : > { %v579_v56 = vadd.f32 %v564_v55, %v344_v53  ;;  %v1597_v55 = vld [vmem:[%s2132_s6 + $0x20] sm:$0xff] }
  0xc1   : > { %v596_v58 = vld [vmem:[#allocation2 + $0x8] sm:$0xff]  ;;  %824 = vmatpush.bf16.msrb.mxu3 %v1597_v55 }
  0xc2   : > { %587 = vst.msk [vmem:[#allocation2 + $0x10] sm:$0xff] %vm334_vm0, %v579_v56  ;;  %v602_v59 = vpack.c.bf16 %v596_v58, %v595_v57  ;;  %v682_v58 = vld [vmem:[%s2131_s5 + $0x10] sm:$0xff] }
  0xc4   : > { %1424 = vmatmul.msk.bf16.vlgmr.msra.gmra.mxu2 %vm334_vm0, %v602_v59  ;;  %v537_v60 = vpop.f32.mrf.mxu0  ;;  %v683_v59 = vld [vmem:[%s2131_s5 + $0x18] sm:$0xff] }
  0xc5   : > { %v565_v62 = vpop.f32.mrf.mxu1 }
  0xc6   : > { %v566_v63 = vadd.f32 %v565_v62, %v537_v60 }
  0xc8   : > { %v580_v0 = vadd.f32 %v566_v63, %v345_v61 }
  0xc9   : > { %v597_v6 = vld [vmem:[#allocation2 + $0x10] sm:$0xff] }
  0xca   : > { %588 = vst.msk [vmem:[#allocation2 + $0x18] sm:$0xff] %vm334_vm0, %v580_v0 }
  0xcc   : > { %v540_v1 = vpop.f32.mrf.mxu0 }
  0xcd   : > { %v568_v3 = vpop.f32.mrf.mxu1 }
  0xce   : > { %v569_v4 = vadd.f32 %v568_v3, %v540_v1  ;;  %v1608_v3 = vld [vmem:[%s2132_s6 + $0x78] sm:$0xff] }
  0xcf   : > { %1048 = vmatpush.bf16.msra.mxu0 %v1608_v3 }
  0xd0   : > { %v581_v5 = vadd.f32 %v569_v4, %v346_v2  ;;  %v1604_v2 = vld [vmem:[%s2132_s6 + $0x58] sm:$0xff]  ;;  %v1610_v4 = vld [vmem:[%s2132_s6 + $0x88] sm:$0xff] }
  0xd1   : > { %v598_v7 = vld [vmem:[#allocation2 + $0x18] sm:$0xff]  ;;  %958 = vmatpush.bf16.msra.mxu2 %v1604_v2  ;;  %1093 = vmatpush.bf16.msra.mxu1 %v1610_v4 }
  0xd2   : > { %589 = vst.msk [vmem:[#allocation2 + $0x20] sm:$0xff] %vm334_vm0, %v581_v5  ;;  %v603_v8 = vpack.c.bf16 %v598_v7, %v597_v6  ;;  %v1603_v5 = vld [vmem:[%s2132_s6 + $0x50] sm:$0xff] }
  0xd3   : > { %v1607_v6 = vld [vmem:[%s2132_s6 + $0x70] sm:$0xff] }
  0xd4   : > { %1425 = vmatmul.msk.bf16.gmra.mxu2 %vm334_vm0, %v603_v8  ;;  %v542_v9 = vpop.f32.mrf.mxu0  ;;  %v1609_v8 = vld [vmem:[%s2132_s6 + $0x80] sm:$0xff]  ;;  %1049 = vmatpush.bf16.msra.mxu0 %v1607_v6 }
  0xd5   : > { %v570_v11 = vpop.f32.mrf.mxu1  ;;  %959 = vmatpush.bf16.msra.mxu2 %v1603_v5  ;;  %1094 = vmatpush.bf16.msra.mxu1 %v1609_v8 }
  0xd6   : > { %v571_v12 = vadd.f32 %v570_v11, %v542_v9 }
  0xd8   : > { %v582_v13 = vadd.f32 %v571_v12, %v347_v10 }
  0xd9   : > { %v599_v19 = vld [vmem:[#allocation2 + $0x20] sm:$0xff] }
  0xda   : > { %590 = vst.msk [vmem:[#allocation2 + $0x28] sm:$0xff] %vm334_vm0, %v582_v13  ;;  %v684_v13 = vld [vmem:[%s2131_s5 + $0x20] sm:$0xff] }
  0xdc   : > { %v545_v14 = vpop.f32.mrf.mxu0 }
  0xdd   : > { %v573_v16 = vpop.f32.mrf.mxu1 }
  0xde   : > { %v574_v17 = vadd.f32 %v573_v16, %v545_v14  ;;  %v685_v14 = vld [vmem:[%s2131_s5 + $0x28] sm:$0xff] }
  0xe0   : > { %v583_v18 = vadd.f32 %v574_v17, %v348_v15 }
  0xe1   : > { %v600_v20 = vld [vmem:[#allocation2 + $0x28] sm:$0xff] }
  0xe2   : > { %v604_v21 = vpack.c.bf16 %v600_v20, %v599_v19  ;;  %591 = vst.msk [vmem:[#allocation2 + $0x30] sm:$0xff] %vm334_vm0, %v583_v18 }
  0xe4   : > { %1426 = vmatmul.msk.bf16.gmra.mxu2 %vm334_vm0, %v604_v21  ;;  %v547_v22 = vpop.f32.mrf.mxu0 }
  0xe5   : > { %v575_v23 = vpop.f32.mrf.mxu1  ;;  %v1606_v22 = vld [vmem:[%s2132_s6 + $0x68] sm:$0xff] }
  0xe9   : > { %v601_v24 = vld [vmem:[#allocation2 + $0x30] sm:$0xff] }
  0xea   : > { %v605_v25 = vpack.c.bf16 %v601_v24, %v601_v24  ;;  %v686_v24 = vld [vmem:[%s2131_s5 + $0x30] sm:$0xff] }
  0xf4   : > { %1427 = vmatmul.msk.bf16.gmra.mxu2 %vm334_vm0, %v605_v25 }
 0x147   : > { %v632_v36 = vpop.f32.mrf.mxu2 }
 0x148   : > { %v655_v37 = vmul.f32 %v1836_v35, %v632_v36 }
 0x14a   : > { %v666_v39 = vadd.f32 %v1842_v38, %v655_v37 }
 0x14c   : > { %v673_v42 = vmax.f32 %v666_v39, 0.0 }
 0x14e   : > { %v687_v47 = vmul.f32 %v680_v44, %v673_v42 }
 0x14f   : > { %v634_v40 = vpop.f32.mrf.mxu2 }
 0x150   : > { %v656_v41 = vmul.f32 %v1836_v35, %v634_v40 }
 0x152   : > { %v667_v43 = vadd.f32 %v1842_v38, %v656_v41 }
 0x154   : > { %v674_v46 = vmax.f32 %v667_v43, 0.0 }
 0x156   : > { %v688_v48 = vmul.f32 %v681_v45, %v674_v46 }
 0x157   : > { %v637_v49 = vpop.f32.mrf.mxu2 }
 0x158   : > { %v1853_v50 = vpack.c.bf16 %v688_v48, %v687_v47  ;;  %v657_v51 = vmul.f32 %v1836_v35, %v637_v49 }
 0x15a   : > { %1436 = vmatmul.msk.bf16.vlgmr.msra.gmra.mxu3 %vm714_vm2, %v1853_v50  ;;  %1452 = vmatmul.msk.bf16.vlgmr.msrb.gmra.mxu2 %vm714_vm2, %v1853_v50  ;;  %v668_v52 = vadd.f32 %v1842_v38, %v657_v51 }
 0x15b   : > { %1484 = vmatmul.msk.bf16.vlgmr.msrb.gmra.mxu0 %vm714_vm2, %v1853_v50  ;;  %1500 = vmatmul.msk.bf16.vlgmr.msrb.gmra.mxu1 %vm714_vm2, %v1853_v50 }
 0x15c   : > { %v675_v56 = vmax.f32 %v668_v52, 0.0  ;;  %1003 = vmatpush.bf16.msra.mxu3 %v1606_v22 }
 0x15e   : > { %v689_v61 = vmul.f32 %v682_v58, %v675_v56 }
 0x15f   : > { %v639_v53 = vpop.f32.mrf.mxu2 }
 0x160   : > { %v658_v54 = vmul.f32 %v1836_v35, %v639_v53  ;;  %1004 = vmatpush.bf16.msra.mxu3 %v1605_v28 }
 0x162   : > { %v669_v57 = vadd.f32 %v1842_v38, %v658_v54 }
 0x164   : > { %v676_v60 = vmax.f32 %v669_v57, 0.0 }
 0x166   : > { %v690_v62 = vmul.f32 %v683_v59, %v676_v60 }
 0x167   : > { %v642_v63 = vpop.f32.mrf.mxu2 }
 0x168   : > { %v1876_v0 = vpack.c.bf16 %v690_v62, %v689_v61  ;;  %v659_v1 = vmul.f32 %v1836_v35, %v642_v63 }
 0x16a   : > { %1437 = vmatmul.msk.bf16.gmra.mxu3 %vm714_vm2, %v1876_v0  ;;  %1453 = vmatmul.msk.bf16.gmra.mxu2 %vm714_vm2, %v1876_v0  ;;  %v670_v7 = vadd.f32 %v1842_v38, %v659_v1 }
 0x16b   : > { %1485 = vmatmul.msk.bf16.gmra.mxu0 %vm714_vm2, %v1876_v0  ;;  %1501 = vmatmul.msk.bf16.gmra.mxu1 %vm714_vm2, %v1876_v0 }
 0x16c   : > { %v677_v11 = vmax.f32 %v670_v7, 0.0 }
 0x16e   : > { %v691_v16 = vmul.f32 %v684_v13, %v677_v11 }
 0x16f   : > { %v644_v9 = vpop.f32.mrf.mxu2 }
 0x170   : > { %v660_v10 = vmul.f32 %v1836_v35, %v644_v9 }
 0x172   : > { %v671_v12 = vadd.f32 %v1842_v38, %v660_v10 }
 0x174   : > { %v678_v15 = vmax.f32 %v671_v12, 0.0 }
 0x176   : > { %v692_v17 = vmul.f32 %v685_v14, %v678_v15 }
 0x177   : > { %v647_v18 = vpop.f32.mrf.mxu2 }
 0x178   : > { %v1914_v19 = vpack.c.bf16 %v692_v17, %v691_v16  ;;  %v661_v20 = vmul.f32 %v1836_v35, %v647_v18 }
 0x17a   : > { %v672_v21 = vadd.f32 %v1842_v38, %v661_v20  ;;  %1438 = vmatmul.msk.bf16.gmra.mxu3 %vm714_vm2, %v1914_v19  ;;  %1454 = vmatmul.msk.bf16.gmra.mxu2 %vm714_vm2, %v1914_v19 }
 0x17b   : > { %1486 = vmatmul.msk.bf16.gmra.mxu0 %vm714_vm2, %v1914_v19  ;;  %1502 = vmatmul.msk.bf16.gmra.mxu1 %vm714_vm2, %v1914_v19 }
 0x17c   : > { %v679_v23 = vmax.f32 %v672_v21, 0.0 }
 0x17e   : > { %v693_v26 = vmul.f32 %v686_v24, %v679_v23 }
 0x17f   : > { %v649_v25 = vpop.f32.mrf.mxu2 }
 0x180   : > { %v1932_v27 = vpack.c.bf16 %v693_v26, %v693_v26 }
 0x18a   : > { %1439 = vmatmul.msk.bf16.gmra.mxu3 %vm714_vm2, %v1932_v27  ;;  %1455 = vmatmul.msk.bf16.gmra.mxu2 %vm714_vm2, %v1932_v27 }
 0x18b   : > { %1487 = vmatmul.msk.bf16.gmra.mxu0 %vm714_vm2, %v1932_v27  ;;  %1503 = vmatmul.msk.bf16.gmra.mxu1 %vm714_vm2, %v1932_v27 }
 0x19a   : > { %1468 = vmatmul.msk.bf16.vlgmr.msrb.gmra.mxu3 %vm714_vm2, %v1853_v50  ;;  %1516 = vmatmul.msk.bf16.vlgmr.msra.gmra.mxu2 %vm714_vm2, %v1853_v50 }
 0x19b   : > { %1548 = vmatmul.msk.bf16.vlgmr.msra.gmra.mxu0 %vm714_vm2, %v1853_v50  ;;  %1564 = vmatmul.msk.bf16.vlgmr.msra.gmra.mxu1 %vm714_vm2, %v1853_v50 }
 0x1aa   : > { %1469 = vmatmul.msk.bf16.gmra.mxu3 %vm714_vm2, %v1876_v0  ;;  %1517 = vmatmul.msk.bf16.gmra.mxu2 %vm714_vm2, %v1876_v0 }
 0x1ab   : > { %1549 = vmatmul.msk.bf16.gmra.mxu0 %vm714_vm2, %v1876_v0  ;;  %1565 = vmatmul.msk.bf16.gmra.mxu1 %vm714_vm2, %v1876_v0 }
 0x1ba   : > { %1470 = vmatmul.msk.bf16.gmra.mxu3 %vm714_vm2, %v1914_v19  ;;  %1518 = vmatmul.msk.bf16.gmra.mxu2 %vm714_vm2, %v1914_v19 }
 0x1bb   : > { %1550 = vmatmul.msk.bf16.gmra.mxu0 %vm714_vm2, %v1914_v19  ;;  %1566 = vmatmul.msk.bf16.gmra.mxu1 %vm714_vm2, %v1914_v19 }
 0x1ca   : > { %1471 = vmatmul.msk.bf16.gmra.mxu3 %vm714_vm2, %v1932_v27  ;;  %1519 = vmatmul.msk.bf16.gmra.mxu2 %vm714_vm2, %v1932_v27 }
 0x1cb   : > { %1551 = vmatmul.msk.bf16.gmra.mxu0 %vm714_vm2, %v1932_v27  ;;  %1567 = vmatmul.msk.bf16.gmra.mxu1 %vm714_vm2, %v1932_v27 }
 0x1d8   : > { %v871_v29 = vpop.f32.mrf.mxu0  ;;  %v916_v30 = vpop.f32.mrf.mxu1 }
 0x1d9   : > { %v1136_v31 = vpack.c.bf16 %v871_v29, %v871_v29  ;;  %v1143_v32 = vpack.c.bf16 %v916_v30, %v916_v30 }
 0x1da   : > { %1532 = vmatmul.msk.bf16.vlgmr.msra.gmra.mxu3 %vm714_vm2, %v1853_v50 }
 0x1db   : > { %1200 = vst.msk [vmem:[%s1981_s18 + $0x54] sm:$0xf] %vm1178_vm3, %v1136_v31 }
 0x1dc   : > { %1207 = vst.msk [vmem:[%s1981_s18 + $0x70] sm:$0xf] %vm1178_vm3, %v1143_v32 }
 0x1dd   : > { %v736_v33 = vpop.f32.mrf.mxu3  ;;  %v781_v34 = vpop.f32.mrf.mxu2 }
 0x1de   : > { %v1115_v35 = vpack.c.bf16 %v736_v33, %v736_v33  ;;  %v1122_v36 = vpack.c.bf16 %v781_v34, %v781_v34 }
 0x1e0   : > { %1179 = vst.msk [vmem:[%s1981_s18] sm:$0xf] %vm1178_vm3, %v1115_v35  ;;  %v873_v37 = vpop.f32.mrf.mxu0  ;;  %v918_v38 = vpop.f32.mrf.mxu1 }
 0x1e1   : > { %1186 = vst.msk [vmem:[%s1981_s18 + $0x1c] sm:$0xf] %vm1178_vm3, %v1122_v36  ;;  %v1137_v39 = vpack.c.bf16 %v873_v37, %v873_v37  ;;  %v1144_v40 = vpack.c.bf16 %v918_v38, %v918_v38 }
 0x1e3   : > { %1201 = vst.msk [vmem:[%s1981_s18 + $0x58] sm:$0xf] %vm1178_vm3, %v1137_v39 }
 0x1e4   : > { %1208 = vst.msk [vmem:[%s1981_s18 + $0x74] sm:$0xf] %vm1178_vm3, %v1144_v40 }
 0x1e5   : > { %v738_v41 = vpop.f32.mrf.mxu3  ;;  %v783_v42 = vpop.f32.mrf.mxu2 }
 0x1e6   : > { %v1116_v43 = vpack.c.bf16 %v738_v41, %v738_v41  ;;  %v1123_v44 = vpack.c.bf16 %v783_v42, %v783_v42 }
 0x1e8   : > { %1180 = vst.msk [vmem:[%s1981_s18 + $0x4] sm:$0xf] %vm1178_vm3, %v1116_v43  ;;  %v876_v45 = vpop.f32.mrf.mxu0  ;;  %v921_v46 = vpop.f32.mrf.mxu1 }
 0x1e9   : > { %1187 = vst.msk [vmem:[%s1981_s18 + $0x20] sm:$0xf] %vm1178_vm3, %v1123_v44  ;;  %v1138_v47 = vpack.c.bf16 %v876_v45, %v876_v45  ;;  %v1145_v48 = vpack.c.bf16 %v921_v46, %v921_v46 }
 0x1ea   : > { %1533 = vmatmul.msk.bf16.gmra.mxu3 %vm714_vm2, %v1876_v0 }
 0x1eb   : > { %1202 = vst.msk [vmem:[%s1981_s18 + $0x5c] sm:$0xf] %vm1178_vm3, %v1138_v47 }
 0x1ec   : > { %1209 = vst.msk [vmem:[%s1981_s18 + $0x78] sm:$0xf] %vm1178_vm3, %v1145_v48 }
 0x1ed   : > { %v741_v49 = vpop.f32.mrf.mxu3  ;;  %v786_v50 = vpop.f32.mrf.mxu2 }
 0x1ee   : > { %v1117_v51 = vpack.c.bf16 %v741_v49, %v741_v49  ;;  %v1124_v52 = vpack.c.bf16 %v786_v50, %v786_v50 }
 0x1f0   : > { %1181 = vst.msk [vmem:[%s1981_s18 + $0x8] sm:$0xf] %vm1178_vm3, %v1117_v51  ;;  %v878_v53 = vpop.f32.mrf.mxu0  ;;  %v923_v54 = vpop.f32.mrf.mxu1 }
 0x1f1   : > { %1188 = vst.msk [vmem:[%s1981_s18 + $0x24] sm:$0xf] %vm1178_vm3, %v1124_v52  ;;  %v1139_v55 = vpack.c.bf16 %v878_v53, %v878_v53  ;;  %v1146_v56 = vpack.c.bf16 %v923_v54, %v923_v54 }
 0x1f3   : > { %1203 = vst.msk [vmem:[%s1981_s18 + $0x60] sm:$0xf] %vm1178_vm3, %v1139_v55 }
 0x1f4   : > { %1210 = vst.msk [vmem:[%s1981_s18 + $0x7c] sm:$0xf] %vm1178_vm3, %v1146_v56 }
 0x1f5   : > { %v743_v57 = vpop.f32.mrf.mxu3  ;;  %v788_v58 = vpop.f32.mrf.mxu2 }
 0x1f6   : > { %v1118_v59 = vpack.c.bf16 %v743_v57, %v743_v57  ;;  %v1125_v60 = vpack.c.bf16 %v788_v58, %v788_v58 }
 0x1f8   : > { %1182 = vst.msk [vmem:[%s1981_s18 + $0xc] sm:$0xf] %vm1178_vm3, %v1118_v59  ;;  %v881_v61 = vpop.f32.mrf.mxu0  ;;  %v926_v62 = vpop.f32.mrf.mxu1 }
 0x1f9   : > { %1189 = vst.msk [vmem:[%s1981_s18 + $0x28] sm:$0xf] %vm1178_vm3, %v1125_v60  ;;  %v1140_v63 = vpack.c.bf16 %v881_v61, %v881_v61  ;;  %v1147_v0 = vpack.c.bf16 %v926_v62, %v926_v62 }
 0x1fa   : > { %1534 = vmatmul.msk.bf16.gmra.mxu3 %vm714_vm2, %v1914_v19 }
 0x1fb   : > { %1204 = vst.msk [vmem:[%s1981_s18 + $0x64] sm:$0xf] %vm1178_vm3, %v1140_v63 }
 0x1fc   : > { %1211 = vst.msk [vmem:[%s1981_s18 + $0x80] sm:$0xf] %vm1178_vm3, %v1147_v0 }
 0x1fd   : > { %v746_v1 = vpop.f32.mrf.mxu3  ;;  %v791_v2 = vpop.f32.mrf.mxu2 }
 0x1fe   : > { %v1119_v3 = vpack.c.bf16 %v746_v1, %v746_v1  ;;  %v1126_v4 = vpack.c.bf16 %v791_v2, %v791_v2 }
 0x200   : > { %1183 = vst.msk [vmem:[%s1981_s18 + $0x10] sm:$0xf] %vm1178_vm3, %v1119_v3  ;;  %v883_v5 = vpop.f32.mrf.mxu0  ;;  %v928_v6 = vpop.f32.mrf.mxu1 }
 0x201   : > { %1190 = vst.msk [vmem:[%s1981_s18 + $0x2c] sm:$0xf] %vm1178_vm3, %v1126_v4  ;;  %v1141_v7 = vpack.c.bf16 %v883_v5, %v883_v5  ;;  %v1148_v8 = vpack.c.bf16 %v928_v6, %v928_v6 }
 0x203   : > { %1205 = vst.msk [vmem:[%s1981_s18 + $0x68] sm:$0xf] %vm1178_vm3, %v1141_v7 }
 0x204   : > { %1212 = vst.msk [vmem:[%s1981_s18 + $0x84] sm:$0xf] %vm1178_vm3, %v1148_v8 }
 0x205   : > { %v748_v9 = vpop.f32.mrf.mxu3  ;;  %v793_v10 = vpop.f32.mrf.mxu2 }
 0x206   : > { %v1120_v11 = vpack.c.bf16 %v748_v9, %v748_v9  ;;  %v1127_v12 = vpack.c.bf16 %v793_v10, %v793_v10 }
 0x208   : > { %1184 = vst.msk [vmem:[%s1981_s18 + $0x14] sm:$0xf] %vm1178_vm3, %v1120_v11  ;;  %v886_v13 = vpop.f32.mrf.mxu0  ;;  %v931_v14 = vpop.f32.mrf.mxu1 }
 0x209   : > { %1191 = vst.msk [vmem:[%s1981_s18 + $0x30] sm:$0xf] %vm1178_vm3, %v1127_v12  ;;  %v1142_v15 = vpack.c.bf16 %v886_v13, %v886_v13  ;;  %v1149_v16 = vpack.c.bf16 %v931_v14, %v931_v14 }
 0x20a   : > { %1535 = vmatmul.msk.bf16.gmra.mxu3 %vm714_vm2, %v1932_v27 }
 0x20b   : > { %1206 = vst.msk [vmem:[%s1981_s18 + $0x6c] sm:$0xf] %vm1178_vm3, %v1142_v15 }
 0x20c   : > { %1213 = vst.msk [vmem:[%s1981_s18 + $0x88] sm:$0xf] %vm1178_vm3, %v1149_v16 }
 0x20d   : > { %v751_v17 = vpop.f32.mrf.mxu3  ;;  %v796_v18 = vpop.f32.mrf.mxu2 }
 0x20e   : > { %v1121_v19 = vpack.c.bf16 %v751_v17, %v751_v17  ;;  %v1128_v20 = vpack.c.bf16 %v796_v18, %v796_v18 }
 0x210   : > { %1185 = vst.msk [vmem:[%s1981_s18 + $0x18] sm:$0xf] %vm1178_vm3, %v1121_v19  ;;  %v888_v21 = vpop.f32.mrf.mxu0  ;;  %v933_v22 = vpop.f32.mrf.mxu1 }
 0x211   : > { %1192 = vst.msk [vmem:[%s1981_s18 + $0x34] sm:$0xf] %vm1178_vm3, %v1128_v20 }
 0x215   : > { %v753_v23 = vpop.f32.mrf.mxu3  ;;  %v798_v24 = vpop.f32.mrf.mxu2 }
 0x218   : > { %v1051_v25 = vpop.f32.mrf.mxu0  ;;  %v1096_v26 = vpop.f32.mrf.mxu1 }
 0x219   : > { %v1164_v27 = vpack.c.bf16 %v1051_v25, %v1051_v25  ;;  %v1171_v28 = vpack.c.bf16 %v1096_v26, %v1096_v26 }
 0x21b   : > { %1228 = vst.msk [vmem:[%s1981_s18 + $0xc4] sm:$0xf] %vm1178_vm3, %v1164_v27 }
 0x21c   : > { %1235 = vst.msk [vmem:[%s1981_s18 + $0xe0] sm:$0xf] %vm1178_vm3, %v1171_v28 }
 0x21d   : > { %v826_v29 = vpop.f32.mrf.mxu3  ;;  %v961_v30 = vpop.f32.mrf.mxu2 }
 0x21e   : > { %v1129_v31 = vpack.c.bf16 %v826_v29, %v826_v29  ;;  %v1150_v32 = vpack.c.bf16 %v961_v30, %v961_v30 }
 0x220   : > { %1193 = vst.msk [vmem:[%s1981_s18 + $0x38] sm:$0xf] %vm1178_vm3, %v1129_v31  ;;  %v1053_v33 = vpop.f32.mrf.mxu0  ;;  %v1098_v34 = vpop.f32.mrf.mxu1 }
 0x221   : > { %1214 = vst.msk [vmem:[%s1981_s18 + $0x8c] sm:$0xf] %vm1178_vm3, %v1150_v32  ;;  %v1165_v35 = vpack.c.bf16 %v1053_v33, %v1053_v33  ;;  %v1172_v36 = vpack.c.bf16 %v1098_v34, %v1098_v34 }
 0x223   : > { %1229 = vst.msk [vmem:[%s1981_s18 + $0xc8] sm:$0xf] %vm1178_vm3, %v1165_v35 }
 0x224   : > { %1236 = vst.msk [vmem:[%s1981_s18 + $0xe4] sm:$0xf] %vm1178_vm3, %v1172_v36 }
 0x225   : > { %v828_v37 = vpop.f32.mrf.mxu3  ;;  %v963_v38 = vpop.f32.mrf.mxu2 }
 0x226   : > { %v1130_v39 = vpack.c.bf16 %v828_v37, %v828_v37  ;;  %v1151_v40 = vpack.c.bf16 %v963_v38, %v963_v38 }
 0x228   : > { %1194 = vst.msk [vmem:[%s1981_s18 + $0x3c] sm:$0xf] %vm1178_vm3, %v1130_v39  ;;  %v1056_v41 = vpop.f32.mrf.mxu0  ;;  %v1101_v42 = vpop.f32.mrf.mxu1 }
 0x229   : > { %1215 = vst.msk [vmem:[%s1981_s18 + $0x90] sm:$0xf] %vm1178_vm3, %v1151_v40  ;;  %v1166_v43 = vpack.c.bf16 %v1056_v41, %v1056_v41  ;;  %v1173_v44 = vpack.c.bf16 %v1101_v42, %v1101_v42 }
 0x22b   : > { %1230 = vst.msk [vmem:[%s1981_s18 + $0xcc] sm:$0xf] %vm1178_vm3, %v1166_v43 }
 0x22c   : > { %1237 = vst.msk [vmem:[%s1981_s18 + $0xe8] sm:$0xf] %vm1178_vm3, %v1173_v44 }
 0x22d   : > { %v831_v45 = vpop.f32.mrf.mxu3  ;;  %v966_v46 = vpop.f32.mrf.mxu2 }
 0x22e   : > { %v1131_v47 = vpack.c.bf16 %v831_v45, %v831_v45  ;;  %v1152_v48 = vpack.c.bf16 %v966_v46, %v966_v46 }
 0x230   : > { %1195 = vst.msk [vmem:[%s1981_s18 + $0x40] sm:$0xf] %vm1178_vm3, %v1131_v47  ;;  %v1058_v49 = vpop.f32.mrf.mxu0  ;;  %v1103_v50 = vpop.f32.mrf.mxu1 }
 0x231   : > { %1216 = vst.msk [vmem:[%s1981_s18 + $0x94] sm:$0xf] %vm1178_vm3, %v1152_v48  ;;  %v1167_v51 = vpack.c.bf16 %v1058_v49, %v1058_v49  ;;  %v1174_v52 = vpack.c.bf16 %v1103_v50, %v1103_v50 }
 0x233   : > { %1231 = vst.msk [vmem:[%s1981_s18 + $0xd0] sm:$0xf] %vm1178_vm3, %v1167_v51 }
 0x234   : > { %1238 = vst.msk [vmem:[%s1981_s18 + $0xec] sm:$0xf] %vm1178_vm3, %v1174_v52 }
 0x235   : > { %v833_v53 = vpop.f32.mrf.mxu3  ;;  %v968_v54 = vpop.f32.mrf.mxu2 }
 0x236   : > { %v1132_v55 = vpack.c.bf16 %v833_v53, %v833_v53  ;;  %v1153_v56 = vpack.c.bf16 %v968_v54, %v968_v54 }
 0x238   : > { %1196 = vst.msk [vmem:[%s1981_s18 + $0x44] sm:$0xf] %vm1178_vm3, %v1132_v55  ;;  %v1061_v57 = vpop.f32.mrf.mxu0  ;;  %v1106_v58 = vpop.f32.mrf.mxu1 }
 0x239   : > { %1217 = vst.msk [vmem:[%s1981_s18 + $0x98] sm:$0xf] %vm1178_vm3, %v1153_v56  ;;  %v1168_v59 = vpack.c.bf16 %v1061_v57, %v1061_v57  ;;  %v1175_v60 = vpack.c.bf16 %v1106_v58, %v1106_v58 }
 0x23b   : > { %1232 = vst.msk [vmem:[%s1981_s18 + $0xd4] sm:$0xf] %vm1178_vm3, %v1168_v59 }
 0x23c   : > { %1239 = vst.msk [vmem:[%s1981_s18 + $0xf0] sm:$0xf] %vm1178_vm3, %v1175_v60 }
 0x23d   : > { %v836_v61 = vpop.f32.mrf.mxu3  ;;  %v971_v62 = vpop.f32.mrf.mxu2 }
 0x23e   : > { %v1133_v63 = vpack.c.bf16 %v836_v61, %v836_v61  ;;  %v1154_v0 = vpack.c.bf16 %v971_v62, %v971_v62 }
 0x240   : > { %1197 = vst.msk [vmem:[%s1981_s18 + $0x48] sm:$0xf] %vm1178_vm3, %v1133_v63  ;;  %v1063_v1 = vpop.f32.mrf.mxu0  ;;  %v1108_v2 = vpop.f32.mrf.mxu1 }
 0x241   : > { %1218 = vst.msk [vmem:[%s1981_s18 + $0x9c] sm:$0xf] %vm1178_vm3, %v1154_v0  ;;  %v1169_v3 = vpack.c.bf16 %v1063_v1, %v1063_v1  ;;  %v1176_v4 = vpack.c.bf16 %v1108_v2, %v1108_v2 }
 0x243   : > { %1233 = vst.msk [vmem:[%s1981_s18 + $0xd8] sm:$0xf] %vm1178_vm3, %v1169_v3 }
 0x244   : > { %1240 = vst.msk [vmem:[%s1981_s18 + $0xf4] sm:$0xf] %vm1178_vm3, %v1176_v4 }
 0x245   : > { %v838_v5 = vpop.f32.mrf.mxu3  ;;  %v973_v6 = vpop.f32.mrf.mxu2 }
 0x246   : > { %v1134_v7 = vpack.c.bf16 %v838_v5, %v838_v5  ;;  %v1155_v8 = vpack.c.bf16 %v973_v6, %v973_v6 }
 0x248   : > { %1198 = vst.msk [vmem:[%s1981_s18 + $0x4c] sm:$0xf] %vm1178_vm3, %v1134_v7  ;;  %v1066_v9 = vpop.f32.mrf.mxu0  ;;  %v1111_v10 = vpop.f32.mrf.mxu1 }
 0x249   : > { %1219 = vst.msk [vmem:[%s1981_s18 + $0xa0] sm:$0xf] %vm1178_vm3, %v1155_v8  ;;  %v1170_v11 = vpack.c.bf16 %v1066_v9, %v1066_v9  ;;  %v1177_v12 = vpack.c.bf16 %v1111_v10, %v1111_v10 }
 0x24b   : > { %1234 = vst.msk [vmem:[%s1981_s18 + $0xdc] sm:$0xf] %vm1178_vm3, %v1170_v11 }
 0x24c   : > { %1241 = vst.msk [vmem:[%s1981_s18 + $0xf8] sm:$0xf] %vm1178_vm3, %v1177_v12 }
 0x24d   : > { %v841_v13 = vpop.f32.mrf.mxu3  ;;  %v976_v14 = vpop.f32.mrf.mxu2 }
 0x24e   : > { %v1135_v15 = vpack.c.bf16 %v841_v13, %v841_v13  ;;  %v1156_v16 = vpack.c.bf16 %v976_v14, %v976_v14 }
 0x250   : > { %1199 = vst.msk [vmem:[%s1981_s18 + $0x50] sm:$0xf] %vm1178_vm3, %v1135_v15  ;;  %v1068_v17 = vpop.f32.mrf.mxu0  ;;  %v1113_v18 = vpop.f32.mrf.mxu1 }
 0x251   : > { %1220 = vst.msk [vmem:[%s1981_s18 + $0xa4] sm:$0xf] %vm1178_vm3, %v1156_v16 }
 0x255   : > { %v843_v19 = vpop.f32.mrf.mxu3  ;;  %v978_v20 = vpop.f32.mrf.mxu2 }
 0x25d   : > { %v1006_v21 = vpop.f32.mrf.mxu3 }
 0x25e   : > { %v1157_v22 = vpack.c.bf16 %v1006_v21, %v1006_v21 }
 0x260   : > { %1221 = vst.msk [vmem:[%s1981_s18 + $0xa8] sm:$0xf] %vm1178_vm3, %v1157_v22 }
 0x265   : > { %v1008_v23 = vpop.f32.mrf.mxu3 }
 0x266   : > { %v1158_v24 = vpack.c.bf16 %v1008_v23, %v1008_v23 }
 0x268   : > { %1222 = vst.msk [vmem:[%s1981_s18 + $0xac] sm:$0xf] %vm1178_vm3, %v1158_v24 }
 0x26d   : > { %v1011_v25 = vpop.f32.mrf.mxu3 }
 0x26e   : > { %v1159_v26 = vpack.c.bf16 %v1011_v25, %v1011_v25 }
 0x270   : > { %1223 = vst.msk [vmem:[%s1981_s18 + $0xb0] sm:$0xf] %vm1178_vm3, %v1159_v26 }
 0x275   : > { %v1013_v27 = vpop.f32.mrf.mxu3 }
 0x276   : > { %v1160_v28 = vpack.c.bf16 %v1013_v27, %v1013_v27 }
 0x278   : > { %1224 = vst.msk [vmem:[%s1981_s18 + $0xb4] sm:$0xf] %vm1178_vm3, %v1160_v28 }
 0x27d   : > { %v1016_v29 = vpop.f32.mrf.mxu3 }
 0x27e   : > { %v1161_v30 = vpack.c.bf16 %v1016_v29, %v1016_v29 }
 0x280   : > { %1225 = vst.msk [vmem:[%s1981_s18 + $0xb8] sm:$0xf] %vm1178_vm3, %v1161_v30 }
 0x285   : > { %v1018_v31 = vpop.f32.mrf.mxu3 }
 0x286   : > { %v1162_v32 = vpack.c.bf16 %v1018_v31, %v1018_v31 }
 0x288   : > { %1226 = vst.msk [vmem:[%s1981_s18 + $0xbc] sm:$0xf] %vm1178_vm3, %v1162_v32 }
 0x28d   : > { %v1021_v33 = vpop.f32.mrf.mxu3 }
 0x28e   : > { %v1163_v34 = vpack.c.bf16 %v1021_v33, %v1021_v33 }
 0x290   : > { %1227 = vst.msk [vmem:[%s1981_s18 + $0xc0] sm:$0xf] %vm1178_vm3, %v1163_v34 }
 0x295   : > { %v1023_v35 = vpop.f32.mrf.mxu3 }
 0x296 PF: > { %s17_s26 = sadd.s32 1, %s1661_s26   ;;  %s2134_s24 = smov %s1657_s25 }
 0x297   : > { %p14_p5 = scmp.ge.s32.totalorder %s17_s26, 4   ;;  %s2135_s25 = smov %s2137_s27 }
 0x299   :  { %16 = sbr.rel (!%p14_p5) target bundleno = 2 (0x2), region = 97 }

</bundles_post_ra>
